<compile_context>
chip_gen: v6e
topology: v6e:2x2x1
jax: 0.10.0
libtpu: 0.0.40
codegen_flags: <defaults>
</compile_context>

<pallas_src>
import jax
import jax.numpy as jnp
from jax.experimental import pallas as pl
from jax.experimental.pallas import tpu as pltpu


_VMEM_STEP_BUDGET = 24 * 1024 * 1024   # per-step working-set target (bytes), fits v5e/v6e/v7x
_VMEM_LIMIT_BYTES = 40 * 1024 * 1024   # explicit scoped-VMEM limit (v5e default is only 16 MiB)
_MAX_BC = 32                           # cap on images per grid step (bounds kernel unrolling)


def _interp_matrix(out_size: int, in_size: int) -> jnp.ndarray:
    """Row-stochastic (out_size, in_size) bilinear interpolation matrix,
    align_corners=False semantics (matches torch.nn.functional.interpolate)."""
    scale = in_size / out_size
    dst = jnp.arange(out_size, dtype=jnp.float32)
    src = jnp.maximum((dst + 0.5) * scale - 0.5, 0.0)
    i0 = jnp.clip(jnp.floor(src).astype(jnp.int32), 0, in_size - 1)
    i1 = jnp.minimum(i0 + 1, in_size - 1)
    frac = src - i0.astype(jnp.float32)
    cols = jnp.arange(in_size, dtype=jnp.int32)[None, :]            # (1, in)
    w0 = (cols == i0[:, None]).astype(jnp.float32) * (1.0 - frac)[:, None]
    w1 = (cols == i1[:, None]).astype(jnp.float32) * frac[:, None]
    return w0 + w1                                                   # (out, in)


def _step_bytes(bc: int, tr: int, h: int, w: int) -> int:
    """Estimated per-grid-step VMEM working set (f32, default double-buffering)."""
    ow = 2 * w
    x_blk = 2 * bc * h * w * 4          # input block, double-buffered
    o_blk = 2 * bc * tr * ow * 4        # output block, double-buffered
    ah_blk = 2 * tr * h * 4             # A_h row chunk
    awt_blk = 2 * w * ow * 4            # A_w^T
    tmp = (tr * w + tr * ow) * 4        # per-image matmul temporaries
    return x_blk + o_blk + ah_blk + awt_blk + tmp


def _pick_tiles(b: int, h: int, w: int):
    """Pick (bc, tr): images per grid step and output rows per grid step."""
    oh = 2 * h

    # Row-chunk candidates: full height first (largest DMAs, fewest grid steps),
    # halving only while the chunk stays a multiple of 8 sublanes.
    tr_cands = [oh]
    t = oh
    while t % 2 == 0 and (t // 2) % 8 == 0 and (t // 2) >= 8:
        t //= 2
        tr_cands.append(t)

    divisors = [d for d in range(1, b + 1) if b % d == 0]

    for tr in tr_cands:
        fitting = [d for d in divisors
                   if d <= _MAX_BC and _step_bytes(d, tr, h, w) <= _VMEM_STEP_BUDGET]
        if fitting:
            bc = max(fitting)
            # v7x's two TensorCores split the "parallel" grid; prefer giving them
            # >= 2 batch chunks (zero redundant HBM reads).  One extra grid step
            # (~0.35us) is negligible on single-TC v5e/v6e.
            if b // bc < 2 and b > 1:
                smaller = [d for d in divisors if d < b and d <= _MAX_BC]
                if smaller:
                    bc = max(smaller)
            # Single image: split rows instead so v7x still gets >= 2 parallel steps.
            if b == 1 and tr == oh and len(tr_cands) > 1:
                tr = tr_cands[1]
            return bc, tr

    # Nothing fits the budget even at bc=1 / smallest row chunk: take the smallest
    # working set and let the explicit vmem limit absorb it.
    return 1, tr_cands[-1]


def _resize_kernel(ah_ref, awt_ref, x_ref, o_ref):
    # ah_ref : (TR, H)      row-interpolation rows for this output-row chunk
    # awt_ref: (W, 2W)      column-interpolation matrix (transposed), shared
    # x_ref  : (BC, H, W)   BC images in native layout (no wrapper transpose)
    # o_ref  : (BC, TR, 2W) native-layout output block (lane-dense when 2W >= 128)
    ah = ah_ref[...]
    awt = awt_ref[...]
    bc = x_ref.shape[0]
    # Short unrolled per-image loop of two dense 2D matmuls.  Row pass first so
    # row-chunking never duplicates column-pass work.  Operands are f32, so the
    # MXU full-precision f32 path is used (matches PyTorch within 1e-5).
    for b in range(bc):
        rows = jnp.dot(ah, x_ref[b], preferred_element_type=jnp.float32)   # (TR, W)
        out = jnp.dot(rows, awt, preferred_element_type=jnp.float32)       # (TR, 2W)
        o_ref[b] = out.astype(o_ref.dtype)


@jax.jit
def resize_2x_bilinear(x: jnp.ndarray) -> jnp.ndarray:
    """x: (N, C, H, W) float32 -> (N, C, 2H, 2W) float32 (bilinear, align_corners=False)."""
    n, c, h, w = x.shape
    oh, ow = 2 * h, 2 * w
    b = n * c

    bc, tr = _pick_tiles(b, h, w)

    a_h = _interp_matrix(oh, h)          # (2H, H)   constant-folded under jit
    a_w_t = _interp_matrix(ow, w).T      # (W, 2W)   constant-folded under jit

    x3 = x.reshape(b, h, w)              # free: merge of contiguous leading dims

    grid = (b // bc, oh // tr)

    out3 = pl.pallas_call(
        _resize_kernel,
        out_shape=jax.ShapeDtypeStruct((b, oh, ow), x.dtype),
        grid=grid,
        in_specs=[
            pl.BlockSpec((tr, h), lambda i, r: (r, 0)),            # A_h row chunk
            pl.BlockSpec((w, ow), lambda i, r: (0, 0)),            # A_w^T (constant, tiny)
            pl.BlockSpec((bc, h, w), lambda i, r: (i, 0, 0)),      # BC native images
        ],
        out_specs=pl.BlockSpec((bc, tr, ow), lambda i, r: (i, r, 0)),
        compiler_params=pltpu.CompilerParams(
            dimension_semantics=("parallel", "parallel"),
            vmem_limit_bytes=_VMEM_LIMIT_BYTES,
        ),
    )(a_h, a_w_t, x3)

    return out3.reshape(n, c, oh, ow)    # free: split of leading dim


def _reference_resize_2x(x: jnp.ndarray) -> jnp.ndarray:
    """Pure-JAX reference: bilinear, align_corners=False, full f32 precision."""
    n, c, h, w = x.shape
    a_h = _interp_matrix(2 * h, h)
    a_w = _interp_matrix(2 * w, w)
    return jnp.einsum("oh,nchw,pw->ncop", a_h, x, a_w,
                      precision=jax.lax.Precision.HIGHEST)


if __name__ == "__main__":
    key = jax.random.PRNGKey(0)
    x = jax.random.normal(key, (2, 4, 16, 16), dtype=jnp.float32)

    out = resize_2x_bilinear(x)
    out = jax.block_until_ready(out)

    ref = _reference_resize_2x(x)
    assert out.shape == (2, 4, 32, 32), out.shape
    # HIGHEST-precision reference: also verifies the in-kernel matmuls take the
    # full-f32 MXU path (no silent bf16 demotion).
    assert jnp.allclose(out, ref, atol=1e-5, rtol=1e-5), float(jnp.max(jnp.abs(out - ref)))

    print("KERNEL_OK")
</pallas_src>

<mosaic_0001>
module attributes {stable_mosaic.version = 11 : i64} {
  func.func @_resize_kernel(%arg0: i32, %arg1: i32, %arg2: memref<32x16xf32, #tpu.memory_space<vmem>>, %arg3: memref<16x32xf32, #tpu.memory_space<vmem>>, %arg4: memref<4x16x16xf32, #tpu.memory_space<vmem>>, %arg5: memref<4x32x32xf32, #tpu.memory_space<vmem>>) attributes {dimension_semantics = [#tpu.dimension_semantics<parallel>, #tpu.dimension_semantics<parallel>], iteration_bounds = array<i64: 2, 1>, scalar_prefetch = 0 : i64, scratch_operands = 0 : i64, tpu.core_type = #tpu.core_type<tc>, window_params = [{transform_indices = @transform_0, window_bounds = array<i64: 32, 16>}, {pipeline_mode = #tpu.pipeline_mode<synchronous>, transform_indices = @transform_1, window_bounds = array<i64: 16, 32>}, {transform_indices = @transform_2, window_bounds = array<i64: 4, 16, 16>}, {transform_indices = @transform_3, window_bounds = array<i64: 4, 32, 32>}]} {
    %c0 = arith.constant 0 : index
    %c0_0 = arith.constant 0 : index
    %0 = vector.load %arg2[%c0, %c0_0] : memref<32x16xf32, #tpu.memory_space<vmem>>, vector<32x16xf32>
    %c0_1 = arith.constant 0 : index
    %c0_2 = arith.constant 0 : index
    %1 = vector.load %arg3[%c0_1, %c0_2] : memref<16x32xf32, #tpu.memory_space<vmem>>, vector<16x32xf32>
    %c0_3 = arith.constant 0 : index
    %c0_4 = arith.constant 0 : index
    %c0_5 = arith.constant 0 : index
    %2 = vector.load %arg4[%c0_3, %c0_4, %c0_5] : memref<4x16x16xf32, #tpu.memory_space<vmem>>, vector<1x16x16xf32>
    %3 = vector.shape_cast %2 : vector<1x16x16xf32> to vector<16x16xf32>
    %cst = arith.constant dense<0.000000e+00> : vector<32x16xf32>
    %4 = tpu.matmul %0, %3, %cst {dimension_numbers = #tpu.dot_dimension_numbers<[1], [0], [0], [1], [0, 0, 1, 1], [], []>} : vector<32x16xf32>, vector<16x16xf32>, vector<32x16xf32> -> vector<32x16xf32>
    %cst_6 = arith.constant dense<0.000000e+00> : vector<32x32xf32>
    %5 = tpu.matmul %4, %1, %cst_6 {dimension_numbers = #tpu.dot_dimension_numbers<[1], [0], [0], [1], [0, 0, 1, 1], [], []>} : vector<32x16xf32>, vector<16x32xf32>, vector<32x32xf32> -> vector<32x32xf32>
    %c0_7 = arith.constant 0 : index
    %c0_8 = arith.constant 0 : index
    %c0_9 = arith.constant 0 : index
    %6 = vector.load %arg5[%c0_7, %c0_8, %c0_9] : memref<4x32x32xf32, #tpu.memory_space<vmem>>, vector<1x32x32xf32>
    %7 = vector.shape_cast %6 : vector<1x32x32xf32> to vector<32x32xf32>
    %8 = vector.shape_cast %5 : vector<32x32xf32> to vector<1x32x32xf32>
    tpu.vector_store %arg5[%c0_7, %c0_8, %c0_9], %8 {strides = array<i32>} : memref<4x32x32xf32, #tpu.memory_space<vmem>>, vector<1x32x32xf32>,
    %c1 = arith.constant 1 : index
    %c0_10 = arith.constant 0 : index
    %c0_11 = arith.constant 0 : index
    %9 = vector.load %arg4[%c1, %c0_10, %c0_11] : memref<4x16x16xf32, #tpu.memory_space<vmem>>, vector<1x16x16xf32>
    %10 = vector.shape_cast %9 : vector<1x16x16xf32> to vector<16x16xf32>
    %cst_12 = arith.constant dense<0.000000e+00> : vector<32x16xf32>
    %11 = tpu.matmul %0, %10, %cst_12 {dimension_numbers = #tpu.dot_dimension_numbers<[1], [0], [0], [1], [0, 0, 1, 1], [], []>} : vector<32x16xf32>, vector<16x16xf32>, vector<32x16xf32> -> vector<32x16xf32>
    %cst_13 = arith.constant dense<0.000000e+00> : vector<32x32xf32>
    %12 = tpu.matmul %11, %1, %cst_13 {dimension_numbers = #tpu.dot_dimension_numbers<[1], [0], [0], [1], [0, 0, 1, 1], [], []>} : vector<32x16xf32>, vector<16x32xf32>, vector<32x32xf32> -> vector<32x32xf32>
    %c1_14 = arith.constant 1 : index
    %c0_15 = arith.constant 0 : index
    %c0_16 = arith.constant 0 : index
    %13 = vector.load %arg5[%c1_14, %c0_15, %c0_16] : memref<4x32x32xf32, #tpu.memory_space<vmem>>, vector<1x32x32xf32>
    %14 = vector.shape_cast %13 : vector<1x32x32xf32> to vector<32x32xf32>
    %15 = vector.shape_cast %12 : vector<32x32xf32> to vector<1x32x32xf32>
    tpu.vector_store %arg5[%c1_14, %c0_15, %c0_16], %15 {strides = array<i32>} : memref<4x32x32xf32, #tpu.memory_space<vmem>>, vector<1x32x32xf32>,
    %c2 = arith.constant 2 : index
    %c0_17 = arith.constant 0 : index
    %c0_18 = arith.constant 0 : index
    %16 = vector.load %arg4[%c2, %c0_17, %c0_18] : memref<4x16x16xf32, #tpu.memory_space<vmem>>, vector<1x16x16xf32>
    %17 = vector.shape_cast %16 : vector<1x16x16xf32> to vector<16x16xf32>
    %cst_19 = arith.constant dense<0.000000e+00> : vector<32x16xf32>
    %18 = tpu.matmul %0, %17, %cst_19 {dimension_numbers = #tpu.dot_dimension_numbers<[1], [0], [0], [1], [0, 0, 1, 1], [], []>} : vector<32x16xf32>, vector<16x16xf32>, vector<32x16xf32> -> vector<32x16xf32>
    %cst_20 = arith.constant dense<0.000000e+00> : vector<32x32xf32>
    %19 = tpu.matmul %18, %1, %cst_20 {dimension_numbers = #tpu.dot_dimension_numbers<[1], [0], [0], [1], [0, 0, 1, 1], [], []>} : vector<32x16xf32>, vector<16x32xf32>, vector<32x32xf32> -> vector<32x32xf32>
    %c2_21 = arith.constant 2 : index
    %c0_22 = arith.constant 0 : index
    %c0_23 = arith.constant 0 : index
    %20 = vector.load %arg5[%c2_21, %c0_22, %c0_23] : memref<4x32x32xf32, #tpu.memory_space<vmem>>, vector<1x32x32xf32>
    %21 = vector.shape_cast %20 : vector<1x32x32xf32> to vector<32x32xf32>
    %22 = vector.shape_cast %19 : vector<32x32xf32> to vector<1x32x32xf32>
    tpu.vector_store %arg5[%c2_21, %c0_22, %c0_23], %22 {strides = array<i32>} : memref<4x32x32xf32, #tpu.memory_space<vmem>>, vector<1x32x32xf32>,
    %c3 = arith.constant 3 : index
    %c0_24 = arith.constant 0 : index
    %c0_25 = arith.constant 0 : index
    %23 = vector.load %arg4[%c3, %c0_24, %c0_25] : memref<4x16x16xf32, #tpu.memory_space<vmem>>, vector<1x16x16xf32>
    %24 = vector.shape_cast %23 : vector<1x16x16xf32> to vector<16x16xf32>
    %cst_26 = arith.constant dense<0.000000e+00> : vector<32x16xf32>
    %25 = tpu.matmul %0, %24, %cst_26 {dimension_numbers = #tpu.dot_dimension_numbers<[1], [0], [0], [1], [0, 0, 1, 1], [], []>} : vector<32x16xf32>, vector<16x16xf32>, vector<32x16xf32> -> vector<32x16xf32>
    %cst_27 = arith.constant dense<0.000000e+00> : vector<32x32xf32>
    %26 = tpu.matmul %25, %1, %cst_27 {dimension_numbers = #tpu.dot_dimension_numbers<[1], [0], [0], [1], [0, 0, 1, 1], [], []>} : vector<32x16xf32>, vector<16x32xf32>, vector<32x32xf32> -> vector<32x32xf32>
    %c3_28 = arith.constant 3 : index
    %c0_29 = arith.constant 0 : index
    %c0_30 = arith.constant 0 : index
    %27 = vector.load %arg5[%c3_28, %c0_29, %c0_30] : memref<4x32x32xf32, #tpu.memory_space<vmem>>, vector<1x32x32xf32>
    %28 = vector.shape_cast %27 : vector<1x32x32xf32> to vector<32x32xf32>
    %29 = vector.shape_cast %26 : vector<32x32xf32> to vector<1x32x32xf32>
    tpu.vector_store %arg5[%c3_28, %c0_29, %c0_30], %29 {strides = array<i32>} : memref<4x32x32xf32, #tpu.memory_space<vmem>>, vector<1x32x32xf32>,
    return
  }
  func.func @transform_0(%arg0: i32, %arg1: i32) -> (i32, i32) {
    %c0_i32 = arith.constant 0 : i32
    %c0_i32_0 = arith.constant 0 : i32
    return %arg1, %c0_i32 : i32, i32
  }
  func.func @transform_1(%arg0: i32, %arg1: i32) -> (i32, i32) {
    %c0_i32 = arith.constant 0 : i32
    %c0_i32_0 = arith.constant 0 : i32
    %c0_i32_1 = arith.constant 0 : i32
    return %c0_i32, %c0_i32_0 : i32, i32
  }
  func.func @transform_2(%arg0: i32, %arg1: i32) -> (i32, i32, i32) {
    %c0_i32 = arith.constant 0 : i32
    %c0_i32_0 = arith.constant 0 : i32
    %c0_i32_1 = arith.constant 0 : i32
    return %arg0, %c0_i32, %c0_i32_0 : i32, i32, i32
  }
  func.func @transform_3(%arg0: i32, %arg1: i32) -> (i32, i32, i32) {
    %c0_i32 = arith.constant 0 : i32
    %c0_i32_0 = arith.constant 0 : i32
    return %arg0, %arg1, %c0_i32 : i32, i32, i32
  }
}

</mosaic_0001>

<bundles_post_ra>
// kernel: resize_2x_bilinear.1
= control target key start
LH: loop header
LB: loop body
LE: loop exit
PB: predicated region body
PF: predicated region fallthrough
CT: control target
= control target key end

     0   :  { %8 = vsyncpa [#allocation3], 0  ;;  %s1767_s0 = inlined_call_operand.vmem [shape: f32[32,16], index: 0, kind: input, shape index: {}]   ;;  %s1768_s1 = inlined_call_operand.vmem [shape: f32[16,32], index: 1, kind: input, shape index: {}]   ;;  %s1769_s2 = inlined_call_operand.hbm [shape: f32[8,16,16], index: 2, kind: input, shape index: {}]   ;;  %s1770_s3 = inlined_call_operand.hbm [shape: f32[8,32,32], index: 3, kind: output, shape index: {}]  }
   0x1   :  { %10 = vsyncpa [#allocation3 + $0x1], 0 }
   0x2   :  { %11 = vsyncpa [#allocation4], 0 }
   0x3   :  { %13 = vsyncpa [#allocation4 + $0x1], 0  ;;  %s1525_s12 = smov 0   ;;  %s1527_s13 = smov 0  }
   0x4   :  { %s1529_s14 = smov 0   ;;  %s1531_s15 = smov 0  }
   0x5   :  { %s1533_s16 = smov 0   ;;  %s1535_s17 = smov 0  }
   0x6 LB: > { %s1123_s18 = sadd.s32 4294967295, %s1497_s17   ;;  %s1124_s19 = sadd.s32 4294967294, %s1497_s17   ;;  %s1497_s17 = sphi %s1535_s17, %s19_s17   ;;  %s1493_s16 = sphi %s1533_s16, %s1781_s16   ;;  %s1489_s15 = sphi %s1531_s15, %s1780_s15   ;;  %s1485_s14 = sphi %s1529_s14, %s1779_s14   ;;  %s1481_s13 = sphi %s1527_s13, %s1778_s13   ;;  %s1477_s12 = sphi %s1525_s12, %s1777_s12  }
   0x7   : > { %s31_s20 = sadd.s32 1, %s1493_s16  ;;  %s85_s21 = sadd.s32 1, %s1485_s14 }
   0x8   : > { %p33_p0 = scmp.ge.s32.totalorder %s31_s20, 2  ;;  %p92_p1 = scmp.ne.s32.totalorder %s1485_s14, %s1481_s13 }
   0x9   : > { %p93_p2 = scmp.eq.s32.totalorder %s1497_s17, 0  ;;  %p98_p3 = scmp.ne.s32.totalorder %s1481_s13, %s1477_s12 }
   0xa   : > { %s1783_s20 = smov (%p33_p0, %s31_s20), 0  ;;  %p99_p5 = scmp.eq.s32.totalorder %s1123_s18, 0 }
   0xb   : > { %p1566_p4 = por %p93_p2, %p92_p1  ;;  %s82_s23 = ssub.s32 %s1493_s16, %s1783_s20 }
   0xc   : > { %p124_p6 = scmp.eq.s32.totalorder %s1123_s18, 1  ;;  %p83_p7 = scmp.eq.s32.totalorder %s82_s23, 0 }
   0xd   : > { %p1572_p8 = por %p99_p5, %p98_p3  ;;  %p130_p10 = scmp.eq.s32.totalorder %s1124_s19, 1 }
   0xe   : > { %p1576_p9 = por %p124_p6, %p92_p1  ;;  %p1335_p13 = scmp.lt.s32.totalorder %s1497_s17, 2 }
   0xf   : > { %s1581_s26 = scalar_select %p83_p7, %s1485_s14, %s85_s21  }
  0x10   : > { %p1583_p11 = por %p130_p10, %p98_p3  ;;  %s162_s28 = sand.u32 1, %s1485_s14  }
  0x11   : > { %s1128_s29 = sshll.u32 %s162_s28, 6  ;;  %s1192_s30 = sshll.u32 %s1493_s16, 10 }
  0x12   : > { %s173_s6 = scalar_lea.hbm %s1769_s2, %s1192_s30  ;;  %s166_s7 = scalar_lea.vmem [#allocation2], %s1128_s29 }
  0x13   : > { %s174_s8 = sshll.u32 %s166_s7, 4  ;;  %p1596_p0 = pnand %p1335_p13, %p1566_p4  ;;  %s175_s8 = int_to_ptr.vmem [resolvable:$true] %s174_s8 }
  0x14   : > { %p1132_p1 = scmp.ge.s32.totalorder %s1497_s17, 1  ;;  %s163_s10 = scalar_lea.sflag [#allocation3], %s162_s28 }
  0x15   : > { %p1391_p2 = pneg %p1596_p0  ;;  %s1402_s11 = scalar_lea.vmem %s175_s8, 1024 }
  0x16   : > { %p1403_p3 = scmp.ne.s32.totalorder %s175_s8, %s1402_s11  ;;  %s1499_s18 = smov [#allocation2]  }
  0x17   : > { %s1407_s19 = sshll.u32 %s1499_s18, 4  ;;  %s1408_s19 = int_to_ptr.vmem [resolvable:$false] %s1407_s19 }
  0x18   : > { %p1405_p5 = pnand %p1403_p3, %p1391_p2  ;;  %s1409_s21 = scalar_lea.vmem %s1408_s19, 2048 }
  0x19   : > { %p1410_p7 = scmp.lt.s32.totalorder %s175_s8, %s1408_s19  ;;  %p1411_p10 = scmp.lt.s32.totalorder %s1409_s21, %s1402_s11 }
  0x1a   : > { %p1406_p6 = pneg %p1405_p5 }
  0x1b   : > { %p1412_p12 = por %p1411_p10, %p1410_p7 }
  0x1d   : > { %p1413_p4 = pnand %p1412_p12, %p1406_p6 }
  0x1f   : > { %1416 = shalt.err (!%p1413_p4)
}
  0x20   : > { %s1500_s22 = smov 128   ;;  %s1501_s23 = smov 8  }
  0x21   : > { %1330 = dma.hbm_to_vmem [thread:$0]  (!%p1596_p0), %s173_s6, 1024, %s175_s8, %s163_s10, %s1500_s22, %s1500_s22, %s1501_s23  }
  0x22   : > { %p182_p13 = scmp.lt.s32.totalorder %s1497_s17, 3 }
  0x24   : > { %p183_p2 = pnand %p1132_p1, %p182_p13 }
  0x25   : > { %s1609_s28 = sand.u32 (!%p183_p2), 1, %s1481_s13  }
  0x26   : > { %186 = sbr.rel (%p183_p2) target bundleno = 482 (0x1e2), region = 32  ;;  %s1133_s29 = sshll.u32 (!%p183_p2), %s1609_s28, 6 }
  0x27   : > { %s189_s30 = scalar_lea.sflag (!%p183_p2), [#allocation3], %s1609_s28  ;;  %s1613_s4 = scalar_lea.vmem (!%p183_p2), [#allocation2], %s1133_s29 }
  0x2b   : > { %1468 = dma.done.wait (%p1572_p8), %s189_s30, 1024  }
  0x2c   : > { %1470 = vsyncadd (%p1572_p8), %s189_s30, 4294966272  ;;  %vm237_vm0 = vcmask 130048   ;;  %v236_v0 = vld [vmem:[%s1613_s4 + $0x8] sm:$0xff]  ;;  %v235_v1 = vld [vmem:[%s1613_s4] sm:$0xff]  ;;  %s1134_s23 = sshll.u32 %s1609_s28, 7  ;;  %vm432_vm1 = vcmask 261120  }
  0x2d   : > { %v229_v2 = vld [vmem:[%s1767_s0] sm:$0xff]  ;;  %1243 = vmatprep.subr.mxu0 %v236_v0  ;;  %v230_v3 = vld [vmem:[%s1767_s0 + $0x8] sm:$0xff]  ;;  %v1144_v4 = vld [vmem:[%s1613_s4 + $0x18] sm:$0xff]  ;;  %s1678_s29 = scalar_lea.vmem [#allocation5], %s1134_s23  ;;  %s1194_s30 = sshll.u32 %s1489_s15, 11 }
  0x2e   : > { %1247 = vmatprep.mubr.msk.f32.mxu0 %vm237_vm0, %v229_v2  ;;  %1244 = vmatpush3.msra.mxu0 %v236_v0  ;;  %v231_v5 = vld [vmem:[%s1767_s0 + $0x10] sm:$0xff]  ;;  %v232_v7 = vld [vmem:[%s1767_s0 + $0x18] sm:$0xff]  ;;  %v1158_v8 = vld [vmem:[%s1613_s4 + $0x28] sm:$0xff]  ;;  %s1713_s7 = scalar_lea.hbm %s1770_s3, %s1194_s30  ;;  %s1008_s15 = scalar_lea.sflag [#allocation4], %s1609_s28 }
  0x2f   : > { %1245 = vmatprep.subr.mxu0 %v235_v1  ;;  %v1143_v6 = vld [vmem:[%s1613_s4 + $0x10] sm:$0xff]  ;;  %v1157_v9 = vld [vmem:[%s1613_s4 + $0x20] sm:$0xff]  ;;  %v1172_v10 = vld [vmem:[%s1613_s4 + $0x38] sm:$0xff]  ;;  %s1502_s24 = smov [#allocation5]  }
  0x30   : > { %1246 = vmatpush3.msra.mxu0 %v235_v1  ;;  %v1171_v11 = vld [vmem:[%s1613_s4 + $0x30] sm:$0xff]  ;;  %v234_v12 = vld [vmem:[%s1768_s1 + $0x8] sm:$0xff]  ;;  %v233_v13 = vld [vmem:[%s1768_s1] sm:$0xff]  ;;  %s1024_s4 = sshll.u32 %s1678_s29, 4  ;;  %s1421_s9 = sshll.u32 %s1502_s24, 4  ;;  %s1715_s4 = int_to_ptr.vmem [resolvable:$true] %s1024_s4  ;;  %s1422_s9 = int_to_ptr.vmem [resolvable:$false] %s1421_s9 }
  0x31   : > { %1248 = vmatmul.mubr.msk.f32.vlgmr.msra.gmra.mxu0 %vm237_vm0, %v230_v3  ;;  %1263 = vmatprep.subr.mxu0 %v1144_v4  ;;  %s1417_s8 = scalar_lea.vmem %s1715_s4, 2048  ;;  %s1423_s10 = scalar_lea.vmem %s1422_s9, 4096 }
  0x32   : > { %1264 = vmatpush3.msra.mxu0 %v1144_v4  ;;  %1250 = vmatprep.mubr.msk.f32.mxu0 %vm237_vm0, %v231_v5  ;;  %p1418_p8 = scmp.ne.s32.totalorder %s1715_s4, %s1417_s8  ;;  %p1424_p1 = scmp.lt.s32.totalorder %s1715_s4, %s1422_s9 }
  0x33   : > { %1265 = vmatprep.subr.mxu0 %v1143_v6  ;;  %1253 = vmatprep.subr.mxu1 %v234_v12  ;;  %p1425_p3 = scmp.lt.s32.totalorder %s1423_s10, %s1417_s8 }
  0x34   : > { %1266 = vmatpush3.msra.mxu0 %v1143_v6  ;;  %1254 = vmatpush3.msra.mxu1 %v234_v12  ;;  %p1419_p12 = pnand %p1418_p8, %p1576_p9 }
  0x35   : > { %1251 = vmatmul.mubr.msk.f32.gmra.mxu0 %vm237_vm0, %v232_v7  ;;  %1283 = vmatprep.subr.mxu0 %v1158_v8  ;;  %p1426_p5 = por %p1425_p3, %p1424_p1 }
  0x36   : > { %1267 = vmatprep.mubr.msk.f32.mxu0 %vm237_vm0, %v229_v2  ;;  %1255 = vmatprep.subr.mxu1 %v233_v13  ;;  %p1420_p0 = pneg %p1419_p12 }
  0x37   : > { %1256 = vmatpush3.msra.mxu1 %v233_v13 }
  0x38   : > { %1273 = vmatprep.subr.mxu1 %v234_v12  ;;  %p1427_p6 = pnand %p1426_p5, %p1420_p0 }
  0x39   : > { %1268 = vmatmul.mubr.msk.f32.vlgmr.msra.gmra.mxu0 %vm237_vm0, %v230_v3 }
  0x3a   : > { %1284 = vmatpush3.msra.mxu0 %v1158_v8  ;;  %1270 = vmatprep.mubr.msk.f32.mxu0 %vm237_vm0, %v231_v5 }
  0x3b   : > { %1285 = vmatprep.subr.mxu0 %v1157_v9 }
  0x3c   : > { %1286 = vmatpush3.msra.mxu0 %v1157_v9 }
  0x3d   : > { %1271 = vmatmul.mubr.msk.f32.gmra.mxu0 %vm237_vm0, %v232_v7  ;;  %1303 = vmatprep.subr.mxu0 %v1172_v10 }
  0x3e   : > { %1287 = vmatprep.mubr.msk.f32.mxu0 %vm237_vm0, %v229_v2 }
  0x41   : > { %1288 = vmatmul.mubr.msk.f32.vlgmr.msra.gmra.mxu0 %vm237_vm0, %v230_v3 }
  0x42   : > { %1304 = vmatpush3.msra.mxu0 %v1172_v10  ;;  %1290 = vmatprep.mubr.msk.f32.mxu0 %vm237_vm0, %v231_v5 }
  0x43   : > { %1305 = vmatprep.subr.mxu0 %v1171_v11 }
  0x44   : > { %1306 = vmatpush3.msra.mxu0 %v1171_v11 }
  0x45   : > { %1291 = vmatmul.mubr.msk.f32.gmra.mxu0 %vm237_vm0, %v232_v7 }
  0x46   : > { %1307 = vmatprep.mubr.msk.f32.mxu0 %vm237_vm0, %v229_v2 }
  0x49   : > { %1308 = vmatmul.mubr.msk.f32.vlgmr.msra.gmra.mxu0 %vm237_vm0, %v230_v3 }
  0x4a   : > { %1310 = vmatprep.mubr.msk.f32.mxu0 %vm237_vm0, %v231_v5 }
  0x4d   : > { %1311 = vmatmul.mubr.msk.f32.gmra.mxu0 %vm237_vm0, %v232_v7 }
  0xf1   : > { %v1249_v14 = vpop.f32.mrf.mxu0 }
  0xf3   : > { %v316_v15 = vpop.f32.mrf.mxu0 }
  0xf4   : > { %1257 = vmatprep.mubr.msk.f32.mxu1 %vm237_vm0, %v316_v15 }
  0xf5   : > { %v1252_v16 = vpop.f32.mrf.mxu0  ;;  %1258 = vmatmul.mubr.msk.f32.vlgmr.msra.gmra.mxu1 %vm237_vm0, %v1249_v14 }
  0xf6   : > { %1274 = vmatpush3.msra.mxu1 %v234_v12 }
  0xf7   : > { %v326_v17 = vpop.f32.mrf.mxu0  ;;  %1275 = vmatprep.subr.mxu1 %v233_v13 }
  0xf8   : > { %1260 = vmatprep.mubr.msk.f32.mxu1 %vm237_vm0, %v326_v17  ;;  %1276 = vmatpush3.msra.mxu1 %v233_v13 }
  0xf9   : > { %1261 = vmatmul.mubr.msk.f32.gmra.mxu1 %vm237_vm0, %v1252_v16  ;;  %v1269_v18 = vpop.f32.mrf.mxu0  ;;  %1293 = vmatprep.subr.mxu1 %v234_v12 }
  0xfb   : > { %v506_v19 = vpop.f32.mrf.mxu0 }
  0xfc   : > { %1277 = vmatprep.mubr.msk.f32.mxu1 %vm237_vm0, %v506_v19 }
  0xfd   : > { %v1272_v20 = vpop.f32.mrf.mxu0  ;;  %1278 = vmatmul.mubr.msk.f32.vlgmr.msra.gmra.mxu1 %vm237_vm0, %v1269_v18 }
  0xfe   : > { %1294 = vmatpush3.msra.mxu1 %v234_v12 }
  0xff   : > { %v516_v21 = vpop.f32.mrf.mxu0  ;;  %1295 = vmatprep.subr.mxu1 %v233_v13 }
 0x100   : > { %1280 = vmatprep.mubr.msk.f32.mxu1 %vm237_vm0, %v516_v21  ;;  %1296 = vmatpush3.msra.mxu1 %v233_v13 }
 0x101   : > { %1281 = vmatmul.mubr.msk.f32.gmra.mxu1 %vm237_vm0, %v1272_v20  ;;  %v1289_v22 = vpop.f32.mrf.mxu0  ;;  %1313 = vmatprep.subr.mxu1 %v234_v12 }
 0x103   : > { %v696_v23 = vpop.f32.mrf.mxu0 }
 0x104   : > { %1297 = vmatprep.mubr.msk.f32.mxu1 %vm237_vm0, %v696_v23 }
 0x105   : > { %v1292_v24 = vpop.f32.mrf.mxu0  ;;  %1298 = vmatmul.mubr.msk.f32.vlgmr.msra.gmra.mxu1 %vm237_vm0, %v1289_v22 }
 0x106   : > { %1314 = vmatpush3.msra.mxu1 %v234_v12 }
 0x107   : > { %v706_v25 = vpop.f32.mrf.mxu0  ;;  %1315 = vmatprep.subr.mxu1 %v233_v13 }
 0x108   : > { %1300 = vmatprep.mubr.msk.f32.mxu1 %vm237_vm0, %v706_v25  ;;  %1316 = vmatpush3.msra.mxu1 %v233_v13 }
 0x109   : > { %1301 = vmatmul.mubr.msk.f32.gmra.mxu1 %vm237_vm0, %v1292_v24  ;;  %v1309_v26 = vpop.f32.mrf.mxu0 }
 0x10b   : > { %v886_v27 = vpop.f32.mrf.mxu0 }
 0x10c   : > { %1317 = vmatprep.mubr.msk.f32.mxu1 %vm237_vm0, %v886_v27 }
 0x10d   : > { %v1312_v28 = vpop.f32.mrf.mxu0  ;;  %1318 = vmatmul.mubr.msk.f32.vlgmr.msra.gmra.mxu1 %vm237_vm0, %v1309_v26 }
 0x10f   : > { %v896_v29 = vpop.f32.mrf.mxu0 }
 0x110   : > { %1320 = vmatprep.mubr.msk.f32.mxu1 %vm237_vm0, %v896_v29 }
 0x111   : > { %1321 = vmatmul.mubr.msk.f32.gmra.mxu1 %vm237_vm0, %v1312_v28 }
 0x1b5   : > { %v1259_v30 = vpop.f32.mrf.mxu1 }
 0x1b6   : > { %434 = vst.msk [vmem:[%s1678_s29 + $0x8] sm:$0xff] %vm432_vm1, %v1259_v30 }
 0x1b7   : > { %v413_v31 = vpop.f32.mrf.mxu1 }
 0x1b8   : > { %433 = vst.msk [vmem:[%s1678_s29] sm:$0xff] %vm432_vm1, %v413_v31 }
 0x1b9   : > { %v1262_v32 = vpop.f32.mrf.mxu1 }
 0x1ba   : > { %436 = vst.msk [vmem:[%s1678_s29 + $0x18] sm:$0xff] %vm432_vm1, %v1262_v32 }
 0x1bb   : > { %v423_v33 = vpop.f32.mrf.mxu1 }
 0x1bc   : > { %435 = vst.msk [vmem:[%s1678_s29 + $0x10] sm:$0xff] %vm432_vm1, %v423_v33 }
 0x1bd   : > { %v1279_v34 = vpop.f32.mrf.mxu1 }
 0x1be   : > { %1154 = vst.msk [vmem:[%s1678_s29 + $0x28] sm:$0xff] %vm432_vm1, %v1279_v34 }
 0x1bf   : > { %v603_v35 = vpop.f32.mrf.mxu1 }
 0x1c0   : > { %1153 = vst.msk [vmem:[%s1678_s29 + $0x20] sm:$0xff] %vm432_vm1, %v603_v35 }
 0x1c1   : > { %v1282_v36 = vpop.f32.mrf.mxu1 }
 0x1c2   : > { %1156 = vst.msk [vmem:[%s1678_s29 + $0x38] sm:$0xff] %vm432_vm1, %v1282_v36 }
 0x1c3   : > { %v613_v37 = vpop.f32.mrf.mxu1 }
 0x1c4   : > { %1155 = vst.msk [vmem:[%s1678_s29 + $0x30] sm:$0xff] %vm432_vm1, %v613_v37 }
 0x1c5   : > { %v1299_v38 = vpop.f32.mrf.mxu1 }
 0x1c6   : > { %1168 = vst.msk [vmem:[%s1678_s29 + $0x48] sm:$0xff] %vm432_vm1, %v1299_v38 }
 0x1c7   : > { %v793_v39 = vpop.f32.mrf.mxu1 }
 0x1c8   : > { %1167 = vst.msk [vmem:[%s1678_s29 + $0x40] sm:$0xff] %vm432_vm1, %v793_v39 }
 0x1c9   : > { %v1302_v40 = vpop.f32.mrf.mxu1 }
 0x1ca   : > { %1170 = vst.msk [vmem:[%s1678_s29 + $0x58] sm:$0xff] %vm432_vm1, %v1302_v40 }
 0x1cb   : > { %v803_v41 = vpop.f32.mrf.mxu1 }
 0x1cc   : > { %1169 = vst.msk [vmem:[%s1678_s29 + $0x50] sm:$0xff] %vm432_vm1, %v803_v41 }
 0x1cd   : > { %v1319_v42 = vpop.f32.mrf.mxu1 }
 0x1ce   : > { %1182 = vst.msk [vmem:[%s1678_s29 + $0x68] sm:$0xff] %vm432_vm1, %v1319_v42 }
 0x1cf   : > { %v983_v43 = vpop.f32.mrf.mxu1 }
 0x1d0   : > { %1181 = vst.msk [vmem:[%s1678_s29 + $0x60] sm:$0xff] %vm432_vm1, %v983_v43 }
 0x1d1   : > { %v1322_v44 = vpop.f32.mrf.mxu1 }
 0x1d2   : > { %1184 = vst.msk [vmem:[%s1678_s29 + $0x78] sm:$0xff] %vm432_vm1, %v1322_v44 }
 0x1d3   : > { %v993_v45 = vpop.f32.mrf.mxu1 }
 0x1d4   : > { %1183 = vst.msk [vmem:[%s1678_s29 + $0x70] sm:$0xff] %vm432_vm1, %v993_v45 }
 0x1d5   : > { %1430 = shalt.err (!%p1427_p6)
}
 0x1d6   : > { %s1431_s11 = scalar_lea.hbm %s1713_s7, 2048  ;;  %s1435_s21 = scalar_lea.hbm %s1770_s3, 4096 }
 0x1d7   : > { %p1432_p7 = scmp.ne.s32.totalorder %s1713_s7, %s1431_s11  ;;  %p1436_p13 = scmp.lt.s32.totalorder %s1713_s7, %s1770_s3 }
 0x1d8   : > { %p1437_p2 = scmp.lt.s32.totalorder %s1435_s21, %s1431_s11 }
 0x1d9   : > { %p1433_p10 = pnand %p1432_p7, %p1576_p9 }
 0x1da   : > { %p1438_p8 = por %p1437_p2, %p1436_p13 }
 0x1db   : > { %p1434_p4 = pneg %p1433_p10 }
 0x1dd   : > { %p1439_p12 = pnand %p1438_p8, %p1434_p4 }
 0x1df   : > { %1442 = shalt.err (!%p1439_p12)
}
 0x1e0   : > { %s1503_s29 = smov 128   ;;  %s1504_s30 = smov 8  }
 0x1e1   : > { %1325 = dma.vmem_to_hbm [thread:$0]  (%p1576_p9), %s1715_s4, 2048, %s1713_s7, %s1008_s15, %s1503_s29, %s1503_s29, %s1504_s30  }
 0x1e2 PF: > { %s1039_s5 = sand.u32 1, %s1477_s12   ;;  %p1776_p0 = scmp.ge.s32.totalorder %s1497_s17, 2 }
 0x1e3   : > { %s1040_s6 = scalar_lea.sflag [#allocation4], %s1039_s5 }
 0x1e4   : > { %p1332_p1 = pnand %p1776_p0, %p1583_p11 }
 0x1e6   : > { %p1333_p3 = pneg %p1332_p1 }
 0x1e8   : > { %1472 = dma.done.wait (%p1333_p3), %s1040_s6, 2048  }
 0x1e9   : > { %1474 = vsyncadd (%p1333_p3), %s1040_s6, 4294965248  ;;  %s19_s17 = sadd.s32 1, %s1497_s17   ;;  %s1777_s12 = smov %s1481_s13 }
 0x1ea   : > { %p16_p5 = scmp.ge.s32.totalorder %s19_s17, 4   ;;  %s1778_s13 = smov %s1485_s14 }
 0x1eb   : > { %s1779_s14 = smov %s1581_s26  ;;  %s1780_s15 = smov %s1493_s16 }
 0x1ec   : > { %s1781_s16 = smov %s1783_s20  ;;  %18 = sbr.rel (!%p16_p5) target bundleno = 6 (0x6), region = 86 }
 0x1f1   :  { %1045 = vsyncpa [#allocation3], 1 }
 0x1f2   :  { %1047 = vsyncpa [#allocation3 + $0x1], 1 }
 0x1f3   :  { %1048 = vsyncpa [#allocation4], 1 }
 0x1f4   :  { %1050 = vsyncpa [#allocation4 + $0x1], 1 }

</bundles_post_ra>
